<compile_context>
chip_gen: v6e
topology: v6e:2x2x1
jax: 0.10.0
libtpu: 0.0.40
codegen_flags: <defaults>
</compile_context>

<pallas_src>
import functools

import jax
import jax.numpy as jnp
from jax import lax
from jax.experimental import pallas as pl
from jax.experimental.pallas import tpu as pltpu

PAD_ID = 0          # tokenizer.pad_id
_LANES = 128        # TPU lane width; sorted-score output padded to this


def _round_up(x, m):
    return ((x + m - 1) // m) * m


def _pick_batch_tile(B, N, L, SP, requested):
    """Largest multiple-of-8 divisor of B that fits the VMEM budget and keeps
    >= 2 grid steps (v7x has 2 TensorCores sharded over 'parallel' axes)."""
    # Approximate VMEM bytes per batch row per grid step: double-buffered
    # inputs/outputs plus the large in-kernel intermediates (all ~4 bytes/elem).
    per_row = (2 * N * L * 4          # candidate tile (double-buffered input)
               + 2 * 4 * N * 4        # four score rows (double-buffered)
               + 2 * (SP + L) * 4     # outputs (double-buffered)
               + N * N * 4            # O(N^2) comparison mask
               + N * SP * 4           # rank one-hot scatter
               + N * L * 4)           # top-1 gather select
    budget = 24 * 1024 * 1024         # conservative across v5e/v6e/v7x
    cap = max(8, min(requested, budget // max(per_row, 1)))
    cap = min(cap, max(B // 2, 1))    # keep >= 2 grid steps when possible
    tb = 0
    for t in range(8, cap + 1, 8):
        if B % t == 0:
            tb = t
    if tb == 0:
        # No sublane-aligned divisor under the cap: fall back to any
        # multiple-of-8 divisor of B, else the full batch.
        for t in range(8, B + 1, 8):
            if B % t == 0:
                tb = t
        if tb == 0:
            tb = B
    return tb


def _fused_kernel(nll_ref, ngram_ref, bt_ref, qa_ref, cand_ref,
                  sorted_ref, out_ref):
    """Per batch tile: combined score, stable descending rank, top-1 gather,
    lengths, and lane-padded sorted scores (lengths packed in the last lane)."""
    nll = nll_ref[...]            # [TB, N] f32
    ngram = ngram_ref[...]
    bt = bt_ref[...]
    qa = qa_ref[...]
    TB, N = nll.shape
    SP = sorted_ref.shape[1]      # lane-padded sorted width (multiple of 128)

    # --- score combination (elementwise, VPU) -----------------------------
    scores = (ngram * 1.5 + (bt + nll) * 0.5) * (qa * 0.9 + 0.1)
    # NaN scores would win every ">" comparison and collide with the true
    # maximum; rank them last instead (reported as -inf in sorted scores).
    scores = jnp.where(jnp.isnan(scores), -jnp.inf, scores)

    # --- stable descending rank: one fused O(N^2) comparison mask ---------
    # rank[b, i] = #{j : s[b,j] > s[b,i]}  +  #{j < i : s[b,j] == s[b,i]}
    # TODO(synk): for large N, restructure so the batch rides the 128-lane
    # axis (compare on scores^T) to improve vreg lane utilization.
    s_i = scores[:, :, None]                                    # [TB, N, 1]
    s_j = scores[:, None, :]                                    # [TB, 1, N]
    i_idx = lax.broadcasted_iota(jnp.int32, (TB, N, N), 1)
    j_idx = lax.broadcasted_iota(jnp.int32, (TB, N, N), 2)
    beats = (s_j > s_i) | ((s_j == s_i) & (j_idx < i_idx))      # single mask
    rank = jnp.sum(beats.astype(jnp.int32), axis=2)             # [TB, N]

    # --- top-1 gather in VMEM: rank == 0 exactly once per row -------------
    cand = cand_ref[...]                                        # [TB, N, L] i32
    win = rank == 0                                             # [TB, N]
    out_rows = jnp.sum(jnp.where(win[:, :, None], cand, 0), axis=1)  # [TB, L]
    out_ref[...] = out_rows

    # --- lengths over the (unpadded) sequence axis -------------------------
    lengths = jnp.sum((out_rows != PAD_ID).astype(jnp.int32), axis=-1)  # [TB]

    # --- scatter scores into sorted order; pack lengths in the last lane ---
    r_iota = lax.broadcasted_iota(jnp.int32, (TB, N, SP), 2)
    onehot = rank[:, :, None] == r_iota                         # [TB, N, SP]
    sorted_vals = jnp.sum(jnp.where(onehot, s_i, 0.0), axis=1)  # [TB, SP]
    lane_iota = lax.broadcasted_iota(jnp.int32, (TB, SP), 1)
    len_col = lengths[:, None].astype(jnp.float32)              # [TB, 1]
    sorted_ref[...] = jnp.where(lane_iota == SP - 1, len_col, sorted_vals)


@functools.partial(jax.jit, static_argnames=("batch_tile",))
def combination_reranker(candidates, nll_scores, ngram_scores,
                         backtrans_scores, qa_scores, *, batch_tile=256):
    """Returns (top1_output [B,L] int32, lengths [B] int32, sorted_scores [B,N] f32)."""
    B, N, L = candidates.shape
    # Lane-padded sorted-score width; strictly > N so the last lane can carry
    # the per-row length (exact in f32 for any realistic sequence length).
    SP = _round_up(N + 1, _LANES)
    TB = _pick_batch_tile(B, N, L, SP, batch_tile)
    num_tiles = B // TB

    cand = candidates.astype(jnp.int32)
    nll = nll_scores.astype(jnp.float32)
    ngram = ngram_scores.astype(jnp.float32)
    bt = backtrans_scores.astype(jnp.float32)
    qa = qa_scores.astype(jnp.float32)

    score_spec = pl.BlockSpec((TB, N), lambda i: (i, 0))
    cand_spec = pl.BlockSpec((TB, N, L), lambda i: (i, 0, 0))

    sorted_pad, out = pl.pallas_call(
        _fused_kernel,
        grid_spec=pltpu.PrefetchScalarGridSpec(
            num_scalar_prefetch=0,
            grid=(num_tiles,),
            in_specs=[score_spec, score_spec, score_spec, score_spec,
                      cand_spec],
            out_specs=[
                pl.BlockSpec((TB, SP), lambda i: (i, 0)),
                pl.BlockSpec((TB, L), lambda i: (i, 0)),
            ],
        ),
        out_shape=[
            jax.ShapeDtypeStruct((B, SP), jnp.float32),
            jax.ShapeDtypeStruct((B, L), jnp.int32),
        ],
        compiler_params=pltpu.CompilerParams(
            dimension_semantics=("parallel",),
            vmem_limit_bytes=32 * 1024 * 1024),
    )(nll, ngram, bt, qa, cand)

    lengths = sorted_pad[:, SP - 1].astype(jnp.int32)
    return out, lengths, sorted_pad[:, :N]


def _reference(candidates, nll, ngram, bt, qa):
    scores = (ngram * 1.5 + (bt + nll) / 2.0) * (qa * 0.9 + 0.1)
    order = jnp.argsort(-scores, axis=-1, stable=True)
    sorted_scores = jnp.take_along_axis(scores, order, axis=-1)
    sorted_seqs = jnp.take_along_axis(candidates, order[:, :, None], axis=1)
    output = sorted_seqs[:, 0, :]
    lengths = jnp.sum(output != PAD_ID, axis=-1)
    return output, lengths, sorted_scores


if __name__ == "__main__":
    key = jax.random.PRNGKey(0)
    B, N, L = 16, 8, 48   # batch, num candidate beams, seq len

    k1, k2, k3, k4, k5, k6 = jax.random.split(key, 6)
    candidates = jax.random.randint(k1, (B, N, L), 1, 100, dtype=jnp.int32)
    # pad out the tail of each candidate with PAD_ID (variable lengths)
    lens = jax.random.randint(k6, (B, N, 1), L // 2, L + 1, dtype=jnp.int32)
    pos = jnp.arange(L)[None, None, :]
    candidates = jnp.where(pos < lens, candidates, PAD_ID).astype(jnp.int32)

    nll_scores = jax.random.normal(k2, (B, N), dtype=jnp.float32)
    ngram_scores = jax.random.uniform(k3, (B, N), dtype=jnp.float32)
    backtrans_scores = jax.random.normal(k4, (B, N), dtype=jnp.float32)
    qa_scores = jax.random.uniform(k5, (B, N), dtype=jnp.float32)

    out, out_lens, sorted_scores = combination_reranker(
        candidates, nll_scores, ngram_scores, backtrans_scores, qa_scores)
    jax.block_until_ready((out, out_lens, sorted_scores))

    ref_out, ref_lens, ref_scores = _reference(
        candidates, nll_scores, ngram_scores, backtrans_scores, qa_scores)

    assert jnp.array_equal(out, ref_out), "top-1 output mismatch"
    assert jnp.array_equal(out_lens, ref_lens), "length mismatch"
    assert jnp.allclose(sorted_scores, ref_scores, atol=1e-5), "score mismatch"

    print("KERNEL_OK")
</pallas_src>

<mosaic_0001>
module attributes {stable_mosaic.version = 11 : i64} {
  func.func @_fused_kernel(%arg0: i32, %arg1: memref<8x8xf32, #tpu.memory_space<vmem>>, %arg2: memref<8x8xf32, #tpu.memory_space<vmem>>, %arg3: memref<8x8xf32, #tpu.memory_space<vmem>>, %arg4: memref<8x8xf32, #tpu.memory_space<vmem>>, %arg5: memref<8x8x48xi32, #tpu.memory_space<vmem>>, %arg6: memref<8x128xf32, #tpu.memory_space<vmem>>, %arg7: memref<8x48xi32, #tpu.memory_space<vmem>>) attributes {dimension_semantics = [#tpu.dimension_semantics<parallel>], iteration_bounds = array<i64: 2>, scalar_prefetch = 0 : i64, scratch_operands = 0 : i64, tpu.core_type = #tpu.core_type<tc>, window_params = [{transform_indices = @transform_0, window_bounds = array<i64: 8, 8>}, {transform_indices = @transform_1, window_bounds = array<i64: 8, 8>}, {transform_indices = @transform_2, window_bounds = array<i64: 8, 8>}, {transform_indices = @transform_3, window_bounds = array<i64: 8, 8>}, {transform_indices = @transform_4, window_bounds = array<i64: 8, 8, 48>}, {transform_indices = @transform_5, window_bounds = array<i64: 8, 128>}, {transform_indices = @transform_6, window_bounds = array<i64: 8, 48>}]} {
    %c0 = arith.constant 0 : index
    %c0_0 = arith.constant 0 : index
    %0 = vector.load %arg1[%c0, %c0_0] : memref<8x8xf32, #tpu.memory_space<vmem>>, vector<8x8xf32>
    %c0_1 = arith.constant 0 : index
    %c0_2 = arith.constant 0 : index
    %1 = vector.load %arg2[%c0_1, %c0_2] : memref<8x8xf32, #tpu.memory_space<vmem>>, vector<8x8xf32>
    %c0_3 = arith.constant 0 : index
    %c0_4 = arith.constant 0 : index
    %2 = vector.load %arg3[%c0_3, %c0_4] : memref<8x8xf32, #tpu.memory_space<vmem>>, vector<8x8xf32>
    %c0_5 = arith.constant 0 : index
    %c0_6 = arith.constant 0 : index
    %3 = vector.load %arg4[%c0_5, %c0_6] : memref<8x8xf32, #tpu.memory_space<vmem>>, vector<8x8xf32>
    %cst = arith.constant 1.500000e+00 : f32
    %4 = vector.broadcast %cst : f32 to vector<8x8xf32>
    %5 = arith.mulf %1, %4 : vector<8x8xf32>
    %6 = arith.addf %2, %0 : vector<8x8xf32>
    %cst_7 = arith.constant 5.000000e-01 : f32
    %7 = vector.broadcast %cst_7 : f32 to vector<8x8xf32>
    %8 = arith.mulf %6, %7 : vector<8x8xf32>
    %9 = arith.addf %5, %8 : vector<8x8xf32>
    %cst_8 = arith.constant 0.899999976 : f32
    %10 = vector.broadcast %cst_8 : f32 to vector<8x8xf32>
    %11 = arith.mulf %3, %10 : vector<8x8xf32>
    %cst_9 = arith.constant 1.000000e-01 : f32
    %12 = vector.broadcast %cst_9 : f32 to vector<8x8xf32>
    %13 = arith.addf %11, %12 : vector<8x8xf32>
    %14 = arith.mulf %9, %13 : vector<8x8xf32>
    %15 = arith.cmpf one, %14, %14 : vector<8x8xf32>
    %cst_10 = arith.constant 0xFF800000 : f32
    %16 = vector.broadcast %cst_10 : f32 to vector<8x8xf32>
    %17 = arith.select %15, %16, %14 : vector<8x8xi1>, vector<8x8xf32>
    %18 = vector.shape_cast %17 : vector<8x8xf32> to vector<8x8x1xf32>
    %19 = vector.shape_cast %17 : vector<8x8xf32> to vector<8x1x8xf32>
    %20 = tpu.iota {dimensions = array<i32: 1>} : vector<8x8x8xi32>
    %21 = tpu.iota {dimensions = array<i32: 2>} : vector<8x8x8xi32>
    %22 = vector.broadcast %19 : vector<8x1x8xf32> to vector<8x8x8xf32>
    %23 = vector.broadcast %18 : vector<8x8x1xf32> to vector<8x8x8xf32>
    %24 = arith.cmpf ogt, %22, %23 : vector<8x8x8xf32>
    %25 = vector.broadcast %19 : vector<8x1x8xf32> to vector<8x8x8xf32>
    %26 = vector.broadcast %18 : vector<8x8x1xf32> to vector<8x8x8xf32>
    %27 = arith.cmpf oeq, %25, %26 : vector<8x8x8xf32>
    %28 = arith.cmpi slt, %21, %20 : vector<8x8x8xi32>
    %29 = arith.andi %27, %28 : vector<8x8x8xi1>
    %30 = arith.ori %24, %29 : vector<8x8x8xi1>
    %31 = arith.extui %30 : vector<8x8x8xi1> to vector<8x8x8xi32>
    %cst_11 = arith.constant dense<0> : vector<8x8xi32>
    %32 = vector.multi_reduction <add>, %31, %cst_11 [2] : vector<8x8x8xi32> to vector<8x8xi32>
    %c0_12 = arith.constant 0 : index
    %c0_13 = arith.constant 0 : index
    %c0_14 = arith.constant 0 : index
    %33 = vector.load %arg5[%c0_12, %c0_13, %c0_14] : memref<8x8x48xi32, #tpu.memory_space<vmem>>, vector<8x8x48xi32>
    %c0_i32 = arith.constant 0 : i32
    %34 = vector.broadcast %c0_i32 : i32 to vector<8x8xi32>
    %35 = arith.cmpi eq, %32, %34 : vector<8x8xi32>
    %36 = vector.shape_cast %35 : vector<8x8xi1> to vector<8x8x1xi1>
    %c0_i32_15 = arith.constant 0 : i32
    %37 = vector.shape_cast %36 : vector<8x8x1xi1> to vector<8x8x1xi1>
    %38 = vector.broadcast %37 : vector<8x8x1xi1> to vector<8x8x48xi1>
    %39 = vector.broadcast %c0_i32_15 : i32 to vector<8x8x48xi32>
    %40 = arith.select %38, %33, %39 : vector<8x8x48xi1>, vector<8x8x48xi32>
    %cst_16 = arith.constant dense<0> : vector<8x48xi32>
    %41 = vector.multi_reduction <add>, %40, %cst_16 [1] : vector<8x8x48xi32> to vector<8x48xi32>
    %c0_17 = arith.constant 0 : index
    %c0_18 = arith.constant 0 : index
    %42 = vector.load %arg7[%c0_17, %c0_18] : memref<8x48xi32, #tpu.memory_space<vmem>>, vector<8x48xi32>
    tpu.vector_store %arg7[%c0_17, %c0_18], %41 {strides = array<i32>} : memref<8x48xi32, #tpu.memory_space<vmem>>, vector<8x48xi32>,
    %c0_i32_19 = arith.constant 0 : i32
    %43 = vector.broadcast %c0_i32_19 : i32 to vector<8x48xi32>
    %44 = arith.cmpi ne, %41, %43 : vector<8x48xi32>
    %45 = arith.extui %44 : vector<8x48xi1> to vector<8x48xi32>
    %cst_20 = arith.constant dense<0> : vector<8xi32>
    %46 = vector.multi_reduction <add>, %45, %cst_20 [1] : vector<8x48xi32> to vector<8xi32>
    %47 = tpu.iota {dimensions = array<i32: 2>} : vector<8x8x128xi32>
    %48 = vector.shape_cast %32 : vector<8x8xi32> to vector<8x8x1xi32>
    %49 = vector.broadcast %48 : vector<8x8x1xi32> to vector<8x8x128xi32>
    %50 = arith.cmpi eq, %49, %47 : vector<8x8x128xi32>
    %cst_21 = arith.constant 0.000000e+00 : f32
    %51 = vector.shape_cast %18 : vector<8x8x1xf32> to vector<8x8x1xf32>
    %52 = vector.broadcast %51 : vector<8x8x1xf32> to vector<8x8x128xf32>
    %53 = vector.broadcast %cst_21 : f32 to vector<8x8x128xf32>
    %54 = arith.select %50, %52, %53 : vector<8x8x128xi1>, vector<8x8x128xf32>
    %cst_22 = arith.constant dense<0.000000e+00> : vector<8x128xf32>
    %55 = vector.multi_reduction <add>, %54, %cst_22 [1] : vector<8x8x128xf32> to vector<8x128xf32>
    %56 = tpu.iota {dimensions = array<i32: 1>} : vector<8x128xi32>
    %57 = vector.shape_cast %46 : vector<8xi32> to vector<8x1xi32>
    %58 = arith.sitofp %57 : vector<8x1xi32> to vector<8x1xf32>
    %c127_i32 = arith.constant 127 : i32
    %59 = vector.broadcast %c127_i32 : i32 to vector<8x128xi32>
    %60 = arith.cmpi eq, %56, %59 : vector<8x128xi32>
    %61 = vector.shape_cast %58 : vector<8x1xf32> to vector<8x1xf32>
    %62 = vector.broadcast %61 : vector<8x1xf32> to vector<8x128xf32>
    %63 = arith.select %60, %62, %55 : vector<8x128xi1>, vector<8x128xf32>
    %c0_23 = arith.constant 0 : index
    %c0_24 = arith.constant 0 : index
    %64 = vector.load %arg6[%c0_23, %c0_24] : memref<8x128xf32, #tpu.memory_space<vmem>>, vector<8x128xf32>
    tpu.vector_store %arg6[%c0_23, %c0_24], %63 {strides = array<i32>} : memref<8x128xf32, #tpu.memory_space<vmem>>, vector<8x128xf32>,
    return
  }
  func.func @transform_0(%arg0: i32) -> (i32, i32) {
    %c0_i32 = arith.constant 0 : i32
    %c0_i32_0 = arith.constant 0 : i32
    return %arg0, %c0_i32 : i32, i32
  }
  func.func @transform_1(%arg0: i32) -> (i32, i32) {
    %c0_i32 = arith.constant 0 : i32
    %c0_i32_0 = arith.constant 0 : i32
    return %arg0, %c0_i32 : i32, i32
  }
  func.func @transform_2(%arg0: i32) -> (i32, i32) {
    %c0_i32 = arith.constant 0 : i32
    %c0_i32_0 = arith.constant 0 : i32
    return %arg0, %c0_i32 : i32, i32
  }
  func.func @transform_3(%arg0: i32) -> (i32, i32) {
    %c0_i32 = arith.constant 0 : i32
    %c0_i32_0 = arith.constant 0 : i32
    return %arg0, %c0_i32 : i32, i32
  }
  func.func @transform_4(%arg0: i32) -> (i32, i32, i32) {
    %c0_i32 = arith.constant 0 : i32
    %c0_i32_0 = arith.constant 0 : i32
    %c0_i32_1 = arith.constant 0 : i32
    return %arg0, %c0_i32, %c0_i32_0 : i32, i32, i32
  }
  func.func @transform_5(%arg0: i32) -> (i32, i32) {
    %c0_i32 = arith.constant 0 : i32
    %c0_i32_0 = arith.constant 0 : i32
    return %arg0, %c0_i32 : i32, i32
  }
  func.func @transform_6(%arg0: i32) -> (i32, i32) {
    %c0_i32 = arith.constant 0 : i32
    %c0_i32_0 = arith.constant 0 : i32
    return %arg0, %c0_i32 : i32, i32
  }
}

</mosaic_0001>

<bundles_post_ra>
// kernel: combination_reranker.1
= control target key start
LH: loop header
LB: loop body
LE: loop exit
PB: predicated region body
PF: predicated region fallthrough
CT: control target
= control target key end

     0   :  { %12 = vsyncpa [#allocation3], 0  ;;  %s1589_s0 = inlined_call_operand.vmem [shape: f32[16,8], index: 0, kind: input, shape index: {}]   ;;  %s1590_s1 = inlined_call_operand.vmem [shape: f32[16,8], index: 1, kind: input, shape index: {}]   ;;  %s1591_s2 = inlined_call_operand.vmem [shape: f32[16,8], index: 2, kind: input, shape index: {}]   ;;  %s1592_s3 = inlined_call_operand.vmem [shape: f32[16,8], index: 3, kind: input, shape index: {}]   ;;  %s1593_s4 = inlined_call_operand.hbm [shape: s32[16,8,48], index: 4, kind: input, shape index: {}]   ;;  %s1594_s5 = inlined_call_operand.vmem [shape: f32[16,128], index: 5, kind: output, shape index: {0}]   ;;  %s1595_s6 = inlined_call_operand.hbm [shape: s32[16,48], index: 6, kind: output, shape index: {1}]  }
   0x1   :  { %14 = vsyncpa [#allocation3 + $0x1], 0 }
   0x2   :  { %15 = vsyncpa [#allocation4], 0 }
   0x3   :  { %17 = vsyncpa [#allocation4 + $0x1], 0  ;;  %s1258_s21 = smov 0   ;;  %s1260_s22 = smov 0  }
   0x4   :  { %s1262_s23 = smov 0   ;;  %s1264_s24 = smov 0  }
   0x5 LB: > { %s1279_s25 = sadd.s32 4294967295, %s1215_s24   ;;  %s1054_s26 = sadd.s32 4294967294, %s1215_s24   ;;  %s1215_s24 = sphi %s1264_s24, %s1616_s24   ;;  %s1211_s23 = sphi %s1262_s23, %s1615_s23   ;;  %s1207_s22 = sphi %s1260_s22, %s1614_s22   ;;  %s1203_s21 = sphi %s1258_s21, %s1613_s21  }
   0x6   : > { %s1283_s27 = sadd.s32 1, %s1215_s24   ;;  %s134_s28 = sadd.s32 1, %s1211_s23 }
   0x7   : > { %s131_s29 = ssub.s32 %s1215_s24, %s1283_s27  ;;  %p141_p0 = scmp.ne.s32.totalorder %s1211_s23, %s1207_s22 }
   0x8   : > { %p132_p1 = scmp.eq.s32.totalorder %s131_s29, 0  ;;  %p142_p2 = scmp.eq.s32.totalorder %s1215_s24, 0 }
   0x9   : > { %p147_p3 = scmp.ne.s32.totalorder %s1207_s22, %s1203_s21  ;;  %p148_p4 = scmp.eq.s32.totalorder %s1279_s25, 0 }
   0xa   : > { %s1295_s30 = scalar_select %p132_p1, %s1211_s23, %s134_s28  }
   0xb   : > { %p1297_p5 = por %p142_p2, %p141_p0  ;;  %p1301_p6 = por %p148_p4, %p147_p3 }
   0xc   : > { %p197_p7 = scmp.eq.s32.totalorder %s1279_s25, 1  ;;  %p203_p8 = scmp.eq.s32.totalorder %s1054_s26, 1 }
   0xd   : > { %s1599_s8 = scalar_select %p1301_p6, 1, 0 }
   0xe   : > { %p1085_p10 = scmp.lt.s32.totalorder %s1215_s24, 2  ;;  %p1308_p11 = por %p197_p7, %p141_p0 }
   0xf   : > { %p1312_p12 = por %p203_p8, %p147_p3  ;;  %s251_s11 = sand.u32 1, %s1211_s23  }
  0x10   : > { %s1600_s9 = scalar_select %p1308_p11, 1, 0 }
  0x11   : > { %s1601_s10 = scalar_select %p1312_p12, 1, 0 }
  0x12   : > { %s1072_s12 = sshll.u32 %s1215_s24, 10  ;;  %s1057_s13 = sshll.u32 %s251_s11, 6 }
  0x13   : > { %s1321_s16 = scalar_lea.hbm %s1593_s4, %s1072_s12  ;;  %s255_s17 = scalar_lea.vmem [#allocation2], %s1057_s13 }
  0x14   : > { %s262_s18 = sshll.u32 %s255_s17, 4  ;;  %p1325_p13 = pnand %p1085_p10, %p1297_p5  ;;  %s1329_s18 = int_to_ptr.vmem [resolvable:$true] %s262_s18 }
  0x15   : > { %s1331_s20 = scalar_lea.sflag [#allocation3], %s251_s11  ;;  %s1123_s26 = scalar_lea.hbm %s1321_s16, 1024 }
  0x16   : > { %p1124_p0 = scmp.ne.s32.totalorder %s1321_s16, %s1123_s26  ;;  %p1125_p1 = pneg %p1325_p13 }
  0x17   : > { %s1128_s12 = scalar_lea.hbm %s1593_s4, 2048  ;;  %p1129_p4 = scmp.lt.s32.totalorder %s1321_s16, %s1593_s4 }
  0x18   : > { %p1126_p2 = pnand %p1125_p1, %p1124_p0  ;;  %p1130_p5 = scmp.lt.s32.totalorder %s1128_s12, %s1123_s26 }
  0x1a   : > { %p1127_p3 = pneg %p1126_p2  ;;  %p1131_p7 = por %p1130_p5, %p1129_p4 }
  0x1c   : > { %p1132_p8 = pnand %p1131_p7, %p1127_p3 }
  0x1e   : > { %1135 = shalt.err (!%p1132_p8)
}
  0x1f   : > { %s1136_s11 = scalar_lea.vmem %s1329_s18, 1024  ;;  %s1217_s14 = smov [#allocation2]  }
  0x20   : > { %p1137_p10 = scmp.ne.s32.totalorder %s1329_s18, %s1136_s11  ;;  %s1141_s15 = sshll.u32 %s1217_s14, 4  ;;  %s1142_s15 = int_to_ptr.vmem [resolvable:$false] %s1141_s15 }
  0x21   : > { %s1143_s17 = scalar_lea.vmem %s1142_s15, 2048  ;;  %p1144_p2 = scmp.lt.s32.totalorder %s1329_s18, %s1142_s15 }
  0x22   : > { %p1139_p9 = pnand %p1137_p10, %p1125_p1  ;;  %p1145_p12 = scmp.lt.s32.totalorder %s1143_s17, %s1136_s11 }
  0x24   : > { %p1140_p0 = pneg %p1139_p9  ;;  %p1146_p11 = por %p1145_p12, %p1144_p2 }
  0x26   : > { %p1147_p6 = pnand %p1146_p11, %p1140_p0 }
  0x28   : > { %1150 = shalt.err (!%p1147_p6)
}
  0x29   : > { %s1218_s26 = smov 128   ;;  %s1219_s28 = smov 8  }
  0x2a   : > { %1080 = dma.hbm_to_vmem [thread:$0]  (!%p1325_p13), %s1321_s16, 1024, %s1329_s18, %s1331_s20, %s1218_s26, %s1218_s26, %s1219_s28  }
  0x2b   : > { %p1060_p9 = scmp.ge.s32.totalorder %s1215_s24, 1  ;;  %p270_p1 = scmp.lt.s32.totalorder %s1215_s24, 3 }
  0x2d   : > { %p271_p3 = pnand %p1060_p9, %p270_p1 }
  0x2e   : > { %s1355_s29 = sand.u32 (!%p271_p3), 1, %s1207_s22   ;;  %p1603_p6 = scmp.ne.s32.totalorder (!%p271_p3), %s1599_s8, 0 }
  0x2f   : > { %274 = sbr.rel (%p271_p3) target bundleno = 552 (0x228), region = 40  ;;  %s1061_s12 = sshll.u32 (!%p271_p3), %s1355_s29, 6 }
  0x30   : > { %s277_s7 = scalar_lea.sflag (!%p271_p3), [#allocation3], %s1355_s29  ;;  %s1359_s13 = scalar_lea.vmem (!%p271_p3), [#allocation2], %s1061_s12 }
  0x34   : > { %1194 = dma.done.wait (%p1603_p6), %s277_s7, 1024  }
  0x35   : > { %1196 = vsyncadd (%p1603_p6), %s277_s7, 4294966272  ;;  %p329_p11 = scmp.lt.s32.totalorder %s1279_s25, 1  ;;  %v363_v0 = vlaneseq  ;;  %v1220_v7 = vmov 1966171168   ;;  %vm554_vm7 = vcmask 64512   ;;  %v1221_v60 = vmov 0  }
  0x36   : > { %v422_v8 = vunpack.c.l.s4 %v1220_v7  ;;  %s1069_s20 = sshll.u32 %s1279_s25, 7  ;;  %s896_s8 = scalar_lea.sflag [#allocation4], %s1355_s29 }
  0x37   : > { %s330_s16 = scalar_select %p329_p11, %s1279_s25, 1  ;;  %v364_v11 = vshrl.u32 %v363_v0, 7  ;;  %v1391_v55 = vand.u32 127, %v363_v0 }
  0x38   : > { %v423_v14 = vunpack.c.0.s8 %v422_v8  ;;  %s910_s15 = scalar_lea.hbm %s1595_s6, %s1069_s20  ;;  %p1610_p13 = scmp.ne.s32.totalorder %s1600_s9, 0 }
  0x39   : > { %s1367_s18 = sshll.u32 %s330_s16, 3  ;;  %v365_v16 = vsub.s32 0, %v364_v11  ;;  %v379_v17 = vsub.s32 2, %v364_v11  ;;  %v372_v18 = vsub.s32 1, %v364_v11  ;;  %v386_v19 = vsub.s32 3, %v364_v11 }
  0x3a   : > { %s332_s11 = scalar_lea.vmem %s1589_s0, %s1367_s18  ;;  %s336_s17 = scalar_lea.vmem %s1590_s1, %s1367_s18  ;;  %v426_v20 = vsub.s32 %v423_v14, %v364_v11  ;;  %v393_v25 = vsub.s32 4, %v364_v11  ;;  %v400_v26 = vsub.s32 5, %v364_v11  ;;  %v407_v35 = vsub.s32 6, %v364_v11 }
  0x3b   : > { %s340_s28 = scalar_lea.vmem %s1591_s2, %s1367_s18  ;;  %s344_s16 = scalar_lea.vmem %s1592_s3, %s1367_s18  ;;  %v350_v1 = vld [vmem:[%s332_s11] sm:$0xff]  ;;  %v414_v36 = vsub.s32 7, %v364_v11  ;;  %vm1394_vm1 = vcmp.lt.s32.totalorder %v1391_v55, %v364_v11 }
  0x3c   : > { %v351_v2 = vld [vmem:[%s336_s17] sm:$0xff] }
  0x3d   : > { %v352_v3 = vld [vmem:[%s340_s28] sm:$0xff]  ;;  %v354_v5 = vmul.f32 1.5, %v351_v2  ;;  %s1222_s28 = smov [#allocation5]  }
  0x3e   : > { %v353_v4 = vld [vmem:[%s344_s16] sm:$0xff]  ;;  %v355_v6 = vadd.f32 %v352_v3, %v350_v1  ;;  %s1155_s12 = sshll.u32 %s1222_s28, 4  ;;  %s1156_s12 = int_to_ptr.vmem [resolvable:$false] %s1155_s12 }
  0x3f   : > { %v358_v9 = vmul.f32 0.9, %v353_v4  ;;  %s1157_s7 = scalar_lea.vmem %s1156_s12, 256 }
  0x40   : > { %v356_v10 = vmul.f32 0.5, %v355_v6 }
  0x41   : > { %v359_v12 = vadd.f32 0.1, %v358_v9 }
  0x42   : > { %v357_v13 = vadd.f32 %v356_v10, %v354_v5 }
  0x44   : > { %v360_v15 = vmul.f32 %v359_v12, %v357_v13 }
  0x46   : > { %vm361_vm0 = vcmp.ne.f32.partialorder %v360_v15, %v360_v15 }
  0x47   : > { %v362_v21 = vsel %vm361_vm0, -inf, %v360_v15 }
  0x48   : > { %v366_v22 = vrot.slane %v362_v21, %v365_v16  ;;  %v380_v23 = vrot.slane %v362_v21, %v379_v17  ;;  %v373_v24 = vrot.slane %v362_v21, %v372_v18  ;;  %v387_v27 = vrot.slane %v362_v21, %v386_v19 }
  0x49   : > { %v427_v28 = vrot.slane %v362_v21, %v426_v20  ;;  %v420_v29 = vcombine.high %v362_v21, %v362_v21  ;;  %v394_v33 = vrot.slane %v362_v21, %v393_v25  ;;  %v401_v34 = vrot.slane %v362_v21, %v400_v26 }
  0x4a   : > { %368 = vbcast.lane.b32.xlu0 %v366_v22, 256  ;;  %382 = vbcast.lane.b32.xlu1 %v380_v23, 256  ;;  %v408_v45 = vrot.slane %v362_v21, %v407_v35  ;;  %v415_v48 = vrot.slane %v362_v21, %v414_v36 }
  0x4b   : > { %v443_v30 = vrot.slane %v427_v28, %v426_v20  ;;  %v435_v31 = vcombine.high %v427_v28, %v427_v28  ;;  %v434_v32 = vrot.slane %v420_v29, %v426_v20 }
  0x4d   : > { %v476_v37 = vrot.slane %v443_v30, %v365_v16  ;;  %v465_v38 = vcombine.high %v443_v30, %v443_v30  ;;  %v457_v39 = vrot.slane %v435_v31, %v426_v20  ;;  %v450_v40 = vrot.slane %v434_v32, %v426_v20 }
  0x4e   : > { %375 = vbcast.lane.b32.xlu0 %v373_v24, 256  ;;  %389 = vbcast.lane.b32.xlu1 %v387_v27, 256  ;;  %v436_v41 = vcombine.high %v434_v32, %v434_v32 }
  0x4f   : > { %v484_v42 = vrot.slane %v465_v38, %v365_v16  ;;  %v480_v43 = vrot.slane %v457_v39, %v365_v16  ;;  %v467_v44 = vcombine.high %v457_v39, %v457_v39  ;;  %v492_v46 = vrot.slane %v450_v40, %v365_v16 }
  0x50   : > { %v464_v47 = vrot.slane %v436_v41, %v426_v20  ;;  %v466_v50 = vcombine.high %v450_v40, %v450_v40 }
  0x51   : > { %v488_v49 = vrot.slane %v467_v44, %v365_v16 }
  0x52   : > { %396 = vbcast.lane.b32.xlu0 %v394_v33, 256  ;;  %403 = vbcast.lane.b32.xlu1 %v401_v34, 256  ;;  %v496_v51 = vrot.slane %v464_v47, %v365_v16  ;;  %v1386_v52 = vrot.slane %v466_v50, %v365_v16  ;;  %v468_v53 = vcombine.high %v464_v47, %v464_v47 }
  0x54   : > { %v1388_v54 = vrot.slane %v468_v53, %v365_v16 }
  0x56   : > { %410 = vbcast.lane.b32.xlu0 %v408_v45, 256  ;;  %417 = vbcast.lane.b32.xlu1 %v415_v48, 256 }
  0xbc   : > { %v1398_v57 = vpop.permute.xlu0 %368  ;;  %v1400_v58 = vpop.permute.xlu1 %382 }
  0xbd   : > { %vm513_vm2 = vcmp.gt.f32.partialorder %v476_v37, %v1398_v57  ;;  %vm521_vm3 = vcmp.eq.f32.partialorder %v476_v37, %v1398_v57  ;;  %vm523_vm4 = vcmp.eq.f32.partialorder %v484_v42, %v1400_v58  ;;  %vm515_vm6 = vcmp.gt.f32.partialorder %v484_v42, %v1400_v58 }
  0xbe   : > { %vm530_vm5 = vmand %vm521_vm3, %vm1394_vm1 }
  0xbf   : > { %vm538_vm8 = vmor %vm513_vm2, %vm530_vm5 }
  0xc0   : > { %vm532_vm9 = vmand %vm523_vm4, %vm1394_vm1  ;;  %v1410_v59 = vpop.permute.xlu0 %375  ;;  %v546_v61 = vsel %vm538_vm8, 1, %v1221_v60  ;;  %v1413_v62 = vpop.permute.xlu1 %389 }
  0xc1   : > { %vm540_vm10 = vmor %vm515_vm6, %vm532_vm9  ;;  %vm514_vm11 = vcmp.gt.f32.partialorder %v480_v43, %v1410_v59  ;;  %vm522_vm12 = vcmp.eq.f32.partialorder %v480_v43, %v1410_v59  ;;  %v555_v63 = vsel %vm554_vm7, %v546_v61, 0  ;;  %vm516_vm14 = vcmp.gt.f32.partialorder %v488_v49, %v1413_v62 }
  0xc2   : > { %vm531_vm13 = vmand %vm522_vm12, %vm1394_vm1  ;;  %v557_v0 = vshrl.u32 %v555_v63, 16  ;;  %vm524_vm15 = vcmp.eq.f32.partialorder %v488_v49, %v1413_v62  ;;  %v548_v1 = vsel %vm540_vm10, 1, %v1221_v60  ;;  %v556_v11 = vand.u32 65535, %v555_v63 }
  0xc3   : > { %vm539_vm0 = vmor %vm514_vm11, %vm531_vm13  ;;  %v581_v2 = vsel %vm554_vm7, %v548_v1, 0 }
  0xc4   : > { %v559_v3 = vcvt.s32.f32 %v557_v0  ;;  %vm533_vm2 = vmand %vm524_vm15, %vm1394_vm1  ;;  %v583_v4 = vshrl.u32 %v581_v2, 16  ;;  %v547_v5 = vsel %vm539_vm0, 1, %v1221_v60  ;;  %v1427_v6 = vpop.permute.xlu0 %396  ;;  %v1429_v7 = vpop.permute.xlu1 %403  ;;  %v558_v22 = vcvt.s32.f32 %v556_v11 }
  0xc5   : > { %vm541_vm3 = vmor %vm516_vm14, %vm533_vm2  ;;  %v568_v8 = vsel %vm554_vm7, %v547_v5, 0  ;;  %vm517_vm4 = vcmp.gt.f32.partialorder %v492_v46, %v1427_v6  ;;  %vm525_vm5 = vcmp.eq.f32.partialorder %v492_v46, %v1427_v6  ;;  %vm518_vm8 = vcmp.gt.f32.partialorder %v496_v51, %v1429_v7 }
  0xc6   : > { %562 = vadd.xlane.f32.xlu0 %v559_v3  ;;  %v585_v9 = vcvt.s32.f32 %v583_v4  ;;  %v570_v10 = vshrl.u32 %v568_v8, 16  ;;  %vm534_vm6 = vmand %vm525_vm5, %vm1394_vm1  ;;  %vm526_vm9 = vcmp.eq.f32.partialorder %v496_v51, %v1429_v7  ;;  %v549_v12 = vsel %vm541_vm3, 1, %v1221_v60 }
  0xc7   : > { %vm542_vm10 = vmor %vm517_vm4, %vm534_vm6  ;;  %v569_v14 = vand.u32 65535, %v568_v8  ;;  %v594_v15 = vsel %vm554_vm7, %v549_v12, 0  ;;  %v582_v24 = vand.u32 65535, %v581_v2  ;;  %v660_v8 = vld [vmem:[%s1359_s13 + $0x8] sm:$0xff] }
  0xc8   : > { %v572_v13 = vcvt.s32.f32 %v570_v10  ;;  %vm535_vm11 = vmand %vm526_vm9, %vm1394_vm1  ;;  %v1442_v16 = vpop.permute.xlu0 %410  ;;  %v550_v17 = vsel %vm542_vm10, 1, %v1221_v60  ;;  %v1445_v18 = vpop.permute.xlu1 %417  ;;  %v596_v20 = vshrl.u32 %v594_v15, 16  ;;  %v595_v31 = vand.u32 65535, %v594_v15  ;;  %v659_v10 = vld [vmem:[%s1359_s13] sm:$0xff] }
  0xc9   : > { %vm1447_vm12 = vmor %vm518_vm8, %vm535_vm11  ;;  %vm519_vm13 = vcmp.gt.f32.partialorder %v1386_v52, %v1442_v16  ;;  %vm527_vm14 = vcmp.eq.f32.partialorder %v1386_v52, %v1442_v16  ;;  %vm520_vm0 = vcmp.gt.f32.partialorder %v1388_v54, %v1445_v18  ;;  %vm528_vm2 = vcmp.eq.f32.partialorder %v1388_v54, %v1445_v18 }
  0xca   : > { %588 = vadd.xlane.f32.xlu0 %v585_v9  ;;  %575 = vadd.xlane.f32.xlu1 %v572_v13  ;;  %vm536_vm15 = vmand %vm527_vm14, %vm1394_vm1  ;;  %v607_v21 = vsel %vm554_vm7, %v550_v17, 0  ;;  %v571_v23 = vcvt.s32.f32 %v569_v14  ;;  %v551_v25 = vsel %vm1447_vm12, 1, %v1221_v60  ;;  %v598_v27 = vcvt.s32.f32 %v596_v20 }
  0xcb   : > { %vm544_vm3 = vmor %vm519_vm13, %vm536_vm15  ;;  %v609_v28 = vshrl.u32 %v607_v21, 16  ;;  %v620_v29 = vsel %vm554_vm7, %v551_v25, 0  ;;  %v584_v30 = vcvt.s32.f32 %v582_v24  ;;  %v597_v36 = vcvt.s32.f32 %v595_v31 }
  0xcc   : > { %vm537_vm4 = vmand %vm528_vm2, %vm1394_vm1  ;;  %v552_v32 = vsel %vm544_vm3, 1, %v1221_v60  ;;  %v622_v34 = vshrl.u32 %v620_v29, 16  ;;  %v608_v37 = vand.u32 65535, %v607_v21  ;;  %v621_v43 = vand.u32 65535, %v620_v29 }
  0xcd   : > { %vm1467_vm5 = vmor %vm520_vm0, %vm537_vm4  ;;  %v611_v33 = vcvt.s32.f32 %v609_v28  ;;  %v633_v35 = vsel %vm554_vm7, %v552_v32, 0  ;;  %vm699_vm1 = vcmask 392192   ;;  %vm756_vm12 = vcmask 1041409  }
  0xce   : > { %560 = vadd.xlane.f32.xlu0 %v558_v22  ;;  %573 = vadd.xlane.f32.xlu1 %v571_v23  ;;  %v553_v38 = vsel %vm1467_vm5, 1, %v1221_v60  ;;  %v624_v39 = vcvt.s32.f32 %v622_v34  ;;  %v635_v40 = vshrl.u32 %v633_v35, 16  ;;  %v610_v42 = vcvt.s32.f32 %v608_v37  ;;  %v661_v34 = vld [vmem:[%s1359_s13 + $0x10] sm:$0xff] }
  0xcf   : > { %v646_v41 = vsel %vm554_vm7, %v553_v38, 0  ;;  %v623_v46 = vcvt.s32.f32 %v621_v43  ;;  %v634_v47 = vand.u32 65535, %v633_v35  ;;  %vm758_vm15 = vcmask 1042434  }
  0xd0   : > { %v637_v44 = vcvt.s32.f32 %v635_v40  ;;  %v648_v45 = vshrl.u32 %v646_v41, 16  ;;  %v647_v50 = vand.u32 65535, %v646_v41  ;;  %vm760_vm3 = vcmask 1043459  }
  0xd1   : > { %v636_v49 = vcvt.s32.f32 %v634_v47 }
  0xd2   : > { %601 = vadd.xlane.f32.xlu0 %v598_v27  ;;  %586 = vadd.xlane.f32.xlu1 %v584_v30  ;;  %v650_v48 = vcvt.s32.f32 %v648_v45  ;;  %v649_v51 = vcvt.s32.f32 %v647_v50  ;;  %v662_v50 = vld [vmem:[%s1359_s13 + $0x18] sm:$0xff] }
  0xd6   : > { %599 = vadd.xlane.f32.xlu1 %v597_v36  ;;  %614 = vadd.xlane.f32.xlu0 %v611_v33 }
  0xda   : > { %627 = vadd.xlane.f32.xlu0 %v624_v39  ;;  %612 = vadd.xlane.f32.xlu1 %v610_v42 }
  0xde   : > { %625 = vadd.xlane.f32.xlu1 %v623_v46  ;;  %640 = vadd.xlane.f32.xlu0 %v637_v44 }
  0xe2   : > { %653 = vadd.xlane.f32.xlu0 %v650_v48  ;;  %638 = vadd.xlane.f32.xlu1 %v636_v49 }
  0xe6   : > { %651 = vadd.xlane.f32.xlu0 %v649_v51 }
 0x14f   : > { %v563_v52 = vpop.xlane.xlu0 %562 }
 0x150   : > { %v565_v56 = vcvt.f32.s32 %v563_v52 }
 0x152   : > { %v566_v3 = vshll.u32 %v565_v56, 16 }
 0x153   : > { %v576_v53 = vpop.xlane.xlu1 %575  ;;  %v589_v54 = vpop.xlane.xlu0 %588 }
 0x154   : > { %v578_v61 = vcvt.f32.s32 %v576_v53  ;;  %v591_v0 = vcvt.f32.s32 %v589_v54 }
 0x156   : > { %v579_v63 = vshll.u32 %v578_v61, 16  ;;  %v592_v12 = vshll.u32 %v591_v0, 16 }
 0x157   : > { %v574_v1 = vpop.xlane.xlu1 %573  ;;  %v561_v2 = vpop.xlane.xlu0 %560 }
 0x158   : > { %v577_v4 = vcvt.f32.s32 %v574_v1  ;;  %v564_v5 = vcvt.f32.s32 %v561_v2 }
 0x15a   : > { %v580_v9 = vadd.s32 %v579_v63, %v577_v4  ;;  %v567_v11 = vadd.s32 %v566_v3, %v564_v5 }
 0x15b   : > { %v587_v13 = vpop.xlane.xlu1 %586  ;;  %v602_v14 = vpop.xlane.xlu0 %601 }
 0x15c   : > { %vm668_vm7 = vcmp.eq.s32.totalorder %v580_v9, 0  ;;  %vm808_vm6 = vcmp.eq.s32.totalorder %v580_v9, %v1391_v55  ;;  %vm667_vm8 = vcmp.eq.s32.totalorder %v567_v11, 0  ;;  %vm807_vm9 = vcmp.eq.s32.totalorder %v567_v11, %v1391_v55 }
 0x15d   : > { %v692_v15 = vsel %vm668_vm7, %v660_v8, 0  ;;  %v816_v17 = vsel %vm808_vm6, %v1410_v59, 0.0  ;;  %v691_v19 = vsel %vm667_vm8, %v659_v10, 0  ;;  %v815_v20 = vsel %vm807_vm9, %v1398_v57, 0.0 }
 0x15e   : > { %v707_v21 = vsel %vm699_vm1, %v692_v15, 0  ;;  %v829_v22 = vrot.slane %v816_v17, 4  ;;  %v700_v23 = vsel %vm699_vm1, %v691_v19, 0  ;;  %v823_v24 = vrot.slane %v815_v20, 4 }
 0x15f   : > { %v708_v25 = vrot.slane %v707_v21, 4  ;;  %v701_v26 = vrot.slane %v700_v23, 4  ;;  %v590_v27 = vcvt.f32.s32 %v587_v13  ;;  %v604_v28 = vcvt.f32.s32 %v602_v14  ;;  %v600_v29 = vpop.xlane.xlu1 %599  ;;  %v615_v32 = vpop.xlane.xlu0 %614 }
 0x160   : > { %v830_v30 = vadd.f32 %v829_v22, %v816_v17  ;;  %v824_v31 = vadd.f32 %v823_v24, %v815_v20  ;;  %v603_v37 = vcvt.f32.s32 %v600_v29  ;;  %v617_v56 = vcvt.f32.s32 %v615_v32  ;;  %v663_v20 = vld [vmem:[%s1359_s13 + $0x20] sm:$0xff] }
 0x161   : > { %v709_v33 = vadd.s32 %v708_v25, %v707_v21  ;;  %v702_v59 = vadd.s32 %v701_v26, %v700_v23  ;;  %v593_v35 = vadd.s32 %v592_v12, %v590_v27  ;;  %v605_v39 = vshll.u32 %v604_v28, 16 }
 0x162   : > { %v831_v36 = vrot.slane %v830_v30, 2  ;;  %v825_v57 = vrot.slane %v824_v31, 2  ;;  %v618_v10 = vshll.u32 %v617_v56, 16  ;;  %vm762_vm8 = vcmask 1044484  }
 0x163   : > { %v710_v38 = vrot.slane %v709_v33, 2  ;;  %vm669_vm10 = vcmp.eq.s32.totalorder %v593_v35, 0  ;;  %vm809_vm11 = vcmp.eq.s32.totalorder %v593_v35, %v1391_v55  ;;  %v703_v44 = vrot.slane %v702_v59, 2  ;;  %v613_v52 = vpop.xlane.xlu1 %612  ;;  %v628_v53 = vpop.xlane.xlu0 %627 }
 0x164   : > { %v832_v40 = vadd.f32 %v831_v36, %v830_v30  ;;  %v826_v41 = vadd.f32 %v825_v57, %v824_v31  ;;  %v693_v42 = vsel %vm669_vm10, %v661_v34, 0  ;;  %v817_v43 = vsel %vm809_vm11, %v1400_v58, 0.0 }
 0x165   : > { %v714_v45 = vsel %vm699_vm1, %v693_v42, 0  ;;  %v835_v46 = vrot.slane %v817_v43, 4  ;;  %v711_v47 = vadd.s32 %v710_v38, %v709_v33  ;;  %v606_v51 = vadd.s32 %v605_v39, %v603_v37  ;;  %v664_v38 = vld [vmem:[%s1359_s13 + $0x28] sm:$0xff] }
 0x166   : > { %v833_v48 = vrot.slane %v832_v40, 1  ;;  %v827_v49 = vrot.slane %v826_v41, 1  ;;  %v715_v0 = vrot.slane %v714_v45, 4  ;;  %v704_v1 = vadd.s32 %v703_v44, %v702_v59 }
 0x167   : > { %v836_v54 = vadd.f32 %v835_v46, %v817_v43  ;;  %vm670_vm13 = vcmp.eq.s32.totalorder %v606_v51, 0  ;;  %v616_v3 = vcvt.f32.s32 %v613_v52  ;;  %v712_v4 = vrot.slane %v711_v47, 1  ;;  %v626_v13 = vpop.xlane.xlu1 %625  ;;  %v641_v14 = vpop.xlane.xlu0 %640 }
 0x168   : > { %v834_v61 = vadd.f32 %v833_v48, %v832_v40  ;;  %v828_v63 = vadd.f32 %v827_v49, %v826_v41  ;;  %v694_v2 = vsel %vm670_vm13, %v662_v50, 0  ;;  %vm810_vm14 = vcmp.eq.s32.totalorder %v606_v51, %v1391_v55 }
 0x169   : > { %v837_v58 = vrot.slane %v836_v54, 2  ;;  %v721_v8 = vsel %vm699_vm1, %v694_v2, 0  ;;  %v716_v11 = vadd.s32 %v715_v0, %v714_v45  ;;  %v705_v15 = vrot.slane %v704_v1, 1 }
 0x16a   : > { %v881_v5 = vsel %vm756_vm12, %v834_v61, %v828_v63  ;;  %v722_v12 = vrot.slane %v721_v8, 4  ;;  %v818_v19 = vsel %vm810_vm14, %v1413_v62, 0.0  ;;  %v619_v21 = vadd.s32 %v618_v10, %v616_v3 }
 0x16b   : > { %v838_v9 = vadd.f32 %v837_v58, %v836_v54  ;;  %v713_v22 = vadd.s32 %v712_v4, %v711_v47  ;;  %v841_v24 = vrot.slane %v818_v19, 4  ;;  %v630_v25 = vcvt.f32.s32 %v628_v53  ;;  %v654_v35 = vpop.xlane.xlu0 %653  ;;  %v639_v45 = vpop.xlane.xlu1 %638 }
 0x16c   : > { %v723_v23 = vadd.s32 %v722_v12, %v721_v8  ;;  %vm671_vm0 = vcmp.eq.s32.totalorder %v619_v21, 0  ;;  %vm811_vm2 = vcmp.eq.s32.totalorder %v619_v21, %v1391_v55  ;;  %v629_v27 = vcvt.f32.s32 %v626_v13  ;;  %v665_v13 = vld [vmem:[%s1359_s13 + $0x30] sm:$0xff] }
 0x16d   : > { %v839_v17 = vrot.slane %v838_v9, 1  ;;  %v717_v28 = vrot.slane %v716_v11, 2  ;;  %v842_v30 = vadd.f32 %v841_v24, %v818_v19  ;;  %v695_v31 = vsel %vm671_vm0, %v663_v20, 0  ;;  %v666_v24 = vld [vmem:[%s1359_s13 + $0x38] sm:$0xff]  ;;  %s1062_s13 = sshll.u32 %s1355_s29, 3 }
 0x16e   : > { %v724_v29 = vrot.slane %v723_v23, 2  ;;  %v728_v62 = vsel %vm699_vm1, %v695_v31, 0  ;;  %v819_v33 = vsel %vm811_vm2, %v1427_v6, 0.0  ;;  %v631_v59 = vshll.u32 %v630_v25, 16  ;;  %s328_s19 = scalar_lea.vmem [#allocation5], %s1062_s13 }
 0x16f   : > { %v840_v26 = vadd.f32 %v839_v17, %v838_v9  ;;  %v843_v34 = vrot.slane %v842_v30, 2  ;;  %v706_v36 = vadd.s32 %v705_v15, %v704_v1  ;;  %v729_v57 = vrot.slane %v728_v62, 4  ;;  %v652_v63 = vpop.xlane.xlu0 %651  ;;  %s912_s17 = sshll.u32 %s328_s19, 4  ;;  %s913_s17 = int_to_ptr.vmem [resolvable:$true] %s912_s17 }
 0x170   : > { %v847_v37 = vrot.slane %v819_v33, 4  ;;  %v632_v39 = vadd.s32 %v631_v59, %v629_v27  ;;  %vm772_vm4 = vcmp.ne.s32.totalorder %v713_v22, 0  ;;  %v718_v40 = vadd.s32 %v717_v28, %v716_v11  ;;  %s1151_s26 = scalar_lea.vmem %s913_s17, 128  ;;  %p1158_p7 = scmp.lt.s32.totalorder %s913_s17, %s1156_s12 }
 0x171   : > { %v882_v32 = vsel %vm758_vm15, %v840_v26, %v881_v5  ;;  %v725_v41 = vadd.s32 %v724_v29, %v723_v23  ;;  %v844_v42 = vadd.f32 %v843_v34, %v842_v30  ;;  %v730_v43 = vadd.s32 %v729_v57, %v728_v62  ;;  %p1152_p12 = scmp.ne.s32.totalorder %s913_s17, %s1151_s26  ;;  %p1159_p8 = scmp.lt.s32.totalorder %s1157_s7, %s1151_s26 }
 0x172   : > { %v848_v44 = vadd.f32 %v847_v37, %v819_v33  ;;  %vm672_vm5 = vcmp.eq.s32.totalorder %v632_v39, 0  ;;  %vm812_vm7 = vcmp.eq.s32.totalorder %v632_v39, %v1391_v55  ;;  %v643_v48 = vcvt.f32.s32 %v641_v14 }
 0x173   : > { %v845_v6 = vrot.slane %v844_v42, 1  ;;  %v696_v46 = vsel %vm672_vm5, %v664_v38, 0  ;;  %v820_v47 = vsel %vm812_vm7, %v1429_v7, 0.0  ;;  %v731_v49 = vrot.slane %v730_v43, 2  ;;  %p1153_p4 = pnand %p1152_p12, %p1610_p13  ;;  %p1160_p10 = por %p1159_p8, %p1158_p7 }
 0x174   : > { %v849_v50 = vrot.slane %v848_v44, 2  ;;  %v735_v51 = vsel %vm699_vm1, %v696_v46, 0  ;;  %v853_v52 = vrot.slane %v820_v47, 4  ;;  %v1505_v53 = vsel %vm756_vm12, %v713_v22, %v706_v36 }
 0x175   : > { %v846_v54 = vadd.f32 %v845_v6, %v844_v42  ;;  %v736_v56 = vrot.slane %v735_v51, 4  ;;  %v642_v61 = vcvt.f32.s32 %v639_v45  ;;  %vm771_vm6 = vcmp.ne.s32.totalorder %v706_v36, 0  ;;  %p1154_p5 = pneg %p1153_p4 }
 0x176   : > { %v719_v0 = vrot.slane %v718_v40, 1  ;;  %v850_v1 = vadd.f32 %v849_v50, %v848_v44  ;;  %v854_v58 = vadd.f32 %v853_v52, %v820_v47  ;;  %v644_v3 = vshll.u32 %v643_v48, 16 }
 0x177   : > { %v883_v7 = vsel %vm760_vm3, %v846_v54, %v882_v32  ;;  %v737_v2 = vadd.s32 %v736_v56, %v735_v51  ;;  %v656_v4 = vcvt.f32.s32 %v654_v35  ;;  %v726_v5 = vrot.slane %v725_v41, 1  ;;  %p1161_p0 = pnand %p1160_p10, %p1154_p5 }
 0x178   : > { %v732_v8 = vadd.s32 %v731_v49, %v730_v43  ;;  %v855_v9 = vrot.slane %v854_v58, 2  ;;  %v655_v10 = vcvt.f32.s32 %v652_v63  ;;  %v780_v11 = vsel %vm772_vm4, 1, %v1221_v60 }
 0x179   : > { %v738_v12 = vrot.slane %v737_v2, 2  ;;  %v645_v14 = vadd.s32 %v644_v3, %v642_v61  ;;  %v657_v15 = vshll.u32 %v656_v4, 16  ;;  %v779_v17 = vsel %vm771_vm6, 1, %v1221_v60 }
 0x17a   : > { %v720_v19 = vadd.s32 %v719_v0, %v718_v40  ;;  %v851_v20 = vrot.slane %v850_v1, 1  ;;  %v856_v21 = vadd.f32 %v855_v9, %v854_v58  ;;  %vm764_vm9 = vcmask 1045509  }
 0x17b   : > { %v739_v23 = vadd.s32 %v738_v12, %v737_v2  ;;  %vm673_vm10 = vcmp.eq.s32.totalorder %v645_v14, 0  ;;  %vm813_vm11 = vcmp.eq.s32.totalorder %v645_v14, %v1391_v55  ;;  %v658_v25 = vadd.s32 %v657_v15, %v655_v10 }
 0x17c   : > { %v727_v26 = vadd.s32 %v726_v5, %v725_v41  ;;  %v733_v22 = vrot.slane %v732_v8, 1  ;;  %v697_v27 = vsel %vm673_vm10, %v665_v13, 0  ;;  %v821_v28 = vsel %vm813_vm11, %v1442_v16, 0.0 }
 0x17d   : > { %v857_v29 = vrot.slane %v856_v21, 1  ;;  %v742_v30 = vsel %vm699_vm1, %v697_v27, 0  ;;  %v859_v31 = vrot.slane %v821_v28, 4  ;;  %vm674_vm13 = vcmp.eq.s32.totalorder %v658_v25, 0 }
 0x17e   : > { %v740_v32 = vrot.slane %v739_v23, 1  ;;  %v743_v62 = vrot.slane %v742_v30, 4  ;;  %v698_v33 = vsel %vm674_vm13, %v666_v24, 0  ;;  %vm814_vm14 = vcmp.eq.s32.totalorder %v658_v25, %v1391_v55 }
 0x17f   : > { %vm766_vm0 = vcmask 1046534   ;;  %v852_v59 = vadd.f32 %v851_v20, %v850_v1  ;;  %v860_v34 = vadd.f32 %v859_v31, %v821_v28  ;;  %v749_v35 = vsel %vm699_vm1, %v698_v33, 0 }
 0x180   : > { %v822_v36 = vsel %vm814_vm14, %v1445_v18, 0.0  ;;  %vm773_vm2 = vcmp.ne.s32.totalorder %v720_v19, 0  ;;  %v744_v57 = vadd.s32 %v743_v62, %v742_v30  ;;  %v750_v16 = vrot.slane %v749_v35, 4 }
 0x181   : > { %v865_v37 = vrot.slane %v822_v36, 4  ;;  %vm774_vm4 = vcmp.ne.s32.totalorder %v727_v26, 0  ;;  %v734_v38 = vadd.s32 %v733_v22, %v732_v8  ;;  %v858_v39 = vadd.f32 %v857_v29, %v856_v21 }
 0x182   : > { %v861_v40 = vrot.slane %v860_v34, 2  ;;  %v741_v41 = vadd.s32 %v740_v32, %v739_v23  ;;  %v745_v42 = vrot.slane %v744_v57, 2  ;;  %v751_v43 = vadd.s32 %v750_v16, %v749_v35 }
 0x183   : > { %v866_v44 = vadd.f32 %v865_v37, %v822_v36  ;;  %v787_v45 = vsel %vm756_vm12, %v780_v11, %v779_v17  ;;  %v759_v6 = vsel %vm758_vm15, %v720_v19, %v1505_v53  ;;  %v884_v18 = vsel %vm762_vm8, %v852_v59, %v883_v7 }
 0x184   : > { %v862_v46 = vadd.f32 %v861_v40, %v860_v34  ;;  %v781_v47 = vsel %vm773_vm2, 1, %v1221_v60  ;;  %v746_v48 = vadd.s32 %v745_v42, %v744_v57  ;;  %v752_v49 = vrot.slane %v751_v43, 2 }
 0x185   : > { %v867_v50 = vrot.slane %v866_v44, 2  ;;  %v782_v51 = vsel %vm774_vm4, 1, %v1221_v60  ;;  %vm775_vm5 = vcmp.ne.s32.totalorder %v734_v38, 0  ;;  %v885_v54 = vsel %vm764_vm9, %v858_v39, %v884_v18 }
 0x186   : > { %v863_v52 = vrot.slane %v862_v46, 1  ;;  %v747_v56 = vrot.slane %v746_v48, 1  ;;  %v753_v61 = vadd.s32 %v752_v49, %v751_v43  ;;  %vm776_vm12 = vcmp.ne.s32.totalorder %v741_v41, 0 }
 0x187   : > { %v868_v53 = vadd.f32 %v867_v50, %v866_v44  ;;  %v761_v63 = vsel %vm760_vm3, %v727_v26, %v759_v6  ;;  %vm768_vm7 = vcmask 1047559   ;;  %v788_v1 = vsel %vm758_vm15, %v781_v47, %v787_v45 }
 0x188   : > { %v864_v0 = vadd.f32 %v863_v52, %v862_v46  ;;  %v748_v7 = vadd.s32 %v747_v56, %v746_v48  ;;  %v754_v2 = vrot.slane %v753_v61, 1  ;;  %v783_v3 = vsel %vm775_vm5, 1, %v1221_v60 }
 0x189   : > { %v869_v58 = vrot.slane %v868_v53, 1  ;;  %v763_v4 = vsel %vm762_vm8, %v734_v38, %v761_v63  ;;  %v784_v5 = vsel %vm776_vm12, 1, %v1221_v60  ;;  %v789_v8 = vsel %vm760_vm3, %v782_v51, %v788_v1 }
 0x18a   : > { %v886_v9 = vsel %vm766_vm0, %v864_v0, %v885_v54  ;;  %v755_v11 = vadd.s32 %v754_v2, %v753_v61  ;;  %v765_v12 = vsel %vm764_vm9, %v741_v41, %v763_v4  ;;  %vm777_vm6 = vcmp.ne.s32.totalorder %v748_v7, 0 }
 0x18b   : > { %v870_v10 = vadd.f32 %v869_v58, %v868_v53  ;;  %v767_v13 = vsel %vm766_vm0, %v748_v7, %v765_v12  ;;  %v785_v14 = vsel %vm777_vm6, 1, %v1221_v60  ;;  %v790_v15 = vsel %vm762_vm8, %v783_v3, %v789_v8 }
 0x18c   : > { %vm778_vm15 = vcmp.ne.s32.totalorder %v755_v11, 0  ;;  %v791_v17 = vsel %vm764_vm9, %v784_v5, %v790_v15  ;;  %v769_v20 = vsel %vm768_vm7, %v755_v11, %v767_v13 }
 0x18d   : > { %v887_v19 = vsel %vm768_vm7, %v870_v10, %v886_v9  ;;  %v786_v21 = vsel %vm778_vm15, 1, %v1221_v60  ;;  %v792_v23 = vsel %vm766_vm0, %v785_v14, %v791_v17  ;;  %770 = vst.msk [vmem:[%s328_s19] sm:$0xff] %vm699_vm1, %v769_v20 }
 0x18e   : > { %v793_v24 = vsel %vm768_vm7, %v786_v21, %v792_v23 }
 0x18f   : > { %v794_v25 = vsel %vm699_vm1, %v793_v24, 0 }
 0x190   : > { %v796_v26 = vshrl.u32 %v794_v25, 16  ;;  %v795_v22 = vand.u32 65535, %v794_v25 }
 0x192   : > { %v798_v27 = vcvt.s32.f32 %v796_v26  ;;  %v797_v28 = vcvt.s32.f32 %v795_v22 }
 0x194   : > { %801 = vadd.xlane.f32.xlu1 %v798_v27  ;;  %799 = vadd.xlane.f32.xlu0 %v797_v28 }
 0x195   : > { %1164 = shalt.err (!%p1161_p0)
}
 0x196   : > { %s1165_s25 = scalar_lea.hbm %s910_s15, 128  ;;  %s1169_s13 = scalar_lea.hbm %s1595_s6, 256 }
 0x197   : > { %p1166_p2 = scmp.ne.s32.totalorder %s910_s15, %s1165_s25  ;;  %p1170_p3 = scmp.lt.s32.totalorder %s910_s15, %s1595_s6 }
 0x198   : > { %p1171_p6 = scmp.lt.s32.totalorder %s1169_s13, %s1165_s25 }
 0x199   : > { %p1167_p9 = pnand %p1166_p2, %p1610_p13 }
 0x19a   : > { %p1172_p11 = por %p1171_p6, %p1170_p3 }
 0x19b   : > { %p1168_p1 = pneg %p1167_p9 }
 0x19d   : > { %p1173_p12 = pnand %p1172_p11, %p1168_p1 }
 0x19f   : > { %1176 = shalt.err (!%p1173_p12)
}
 0x1a0   : > { %1075 = dma.vmem_to_hbm [thread:$0]  (%p1610_p13), %s913_s17, 128, %s910_s15, %s896_s8   ;;  %vm872_vm1 = vcmp.eq.s32.totalorder %v1391_v55, 127 }
 0x1a1   : > { %s349_s26 = scalar_lea.vmem %s1594_s5, %s1367_s18 }
 0x21d   : > { %v802_v60 = vpop.xlane.xlu1 %801  ;;  %v800_v29 = vpop.xlane.xlu0 %799 }
 0x21e   : > { %v804_v30 = vcvt.f32.s32 %v802_v60  ;;  %v803_v32 = vcvt.f32.s32 %v800_v29 }
 0x220   : > { %v805_v31 = vshll.u32 %v804_v30, 16 }
 0x222   : > { %v806_v62 = vadd.s32 %v805_v31, %v803_v32 }
 0x224   : > { %v871_v33 = vcvt.s32.f32 %v806_v62 }
 0x226   : > { %v889_v59 = vsel %vm872_vm1, %v871_v33, %v887_v19 }
 0x227   : > { %890 = vst [vmem:[%s349_s26] sm:$0xff] %v889_v59 }
 0x228 PF: > { %s931_s9 = sand.u32 1, %s1203_s21   ;;  %p1611_p13 = scmp.ne.s32.totalorder %s1601_s10, 0 }
 0x229   : > { %p1612_p4 = scmp.ge.s32.totalorder %s1215_s24, 2  ;;  %s932_s15 = scalar_lea.sflag [#allocation4], %s931_s9 }
 0x22b   : > { %p1082_p5 = pnand %p1612_p4, %p1611_p13 }
 0x22d   : > { %p1083_p7 = pneg %p1082_p5 }
 0x22f   : > { %1198 = dma.done.wait (%p1083_p7), %s932_s15, 128  }
 0x230   : > { %1200 = vsyncadd (%p1083_p7), %s932_s15, 4294967168  ;;  %p20_p8 = scmp.ge.s32.totalorder %s1283_s27, 4   ;;  %s1613_s21 = smov %s1207_s22 }
 0x231   : > { %s1614_s22 = smov %s1211_s23  ;;  %s1615_s23 = smov %s1295_s30 }
 0x232   : > { %s1616_s24 = smov %s1283_s27  ;;  %22 = sbr.rel (!%p20_p8) target bundleno = 5 (0x5), region = 109 }
 0x237   :  { %937 = vsyncpa [#allocation3], 1 }
 0x238   :  { %939 = vsyncpa [#allocation3 + $0x1], 1 }
 0x239   :  { %940 = vsyncpa [#allocation4], 1 }
 0x23a   :  { %942 = vsyncpa [#allocation4 + $0x1], 1 }

</bundles_post_ra>
